<compile_context>
chip_gen: v7x
topology: tpu7x:2x2x1
jax: 0.10.0
libtpu: 0.0.40
codegen_flags: <defaults>
</compile_context>

<pallas_src>
import functools

import jax
import jax.numpy as jnp
import numpy as np
from jax import lax
from jax.experimental import pallas as pl
from jax.experimental.pallas import tpu as pltpu

_LANES = 128
_VMEM_LIMIT = 32 * 1024 * 1024   # within scoped budgets on v5e/v6e/v7x


def _pick_row_tile(n_rows, max_rows=512):
    """Largest row tile <= max_rows that divides n_rows (multiple of 8 when tiling)."""
    if n_rows <= max_rows:
        return n_rows
    for t in range(max_rows, 0, -8):
        if n_rows % t == 0:
            return t
    # TODO(synk): ragged n_rows with no 8-multiple divisor; falls back to one
    # big block (may need a larger VMEM limit for huge volumes).
    return n_rows


# ---------------------------------------------------------------------------
# Phase 1: 1x1x1 conv (c_in channel FMAs) + partial BatchNorm statistics
# ---------------------------------------------------------------------------
def _stats_kernel(x_ref, w_ref, b_ref, psum_ref, *, c_in, c_out):
    """x_ref: (1, c_in, tr, 128) VMEM; w_ref: (c_in*c_out,) SMEM; b_ref: (c_out,) SMEM.
    psum_ref: (1, 1, 2*c_out, 128) VMEM — per-tile lane-wise [sum, sumsq] per channel."""
    xs = [x_ref[0, i, :, :].astype(jnp.float32) for i in range(c_in)]  # hoisted loads
    sum_rows, sq_rows = [], []
    for o in range(c_out):
        acc = xs[0] * w_ref[o]
        for i in range(1, c_in):
            acc = acc + xs[i] * w_ref[i * c_out + o]
        y = acc + b_ref[o]
        sum_rows.append(jnp.sum(y, axis=0, keepdims=True))        # (1, 128)
        sq_rows.append(jnp.sum(y * y, axis=0, keepdims=True))     # (1, 128)
    psum_ref[0, 0, :, :] = jnp.concatenate(sum_rows + sq_rows, axis=0)


# ---------------------------------------------------------------------------
# Phase 2: conv with BN scale/shift folded into the weights + ReLU
# ---------------------------------------------------------------------------
def _norm_kernel(x_ref, w_ref, b_ref, feat_ref, *, c_in, c_out):
    """x_ref: (1, c_in, tr, 128) VMEM; w_ref: (c_in*c_out,) SMEM (BN-folded);
    b_ref: (c_out,) SMEM; feat_ref: (1, c_out, tr, 128) VMEM."""
    xs = [x_ref[0, i, :, :].astype(jnp.float32) for i in range(c_in)]  # hoisted loads
    for o in range(c_out):
        acc = xs[0] * w_ref[o]
        for i in range(1, c_in):
            acc = acc + xs[i] * w_ref[i * c_out + o]
        acc = acc + b_ref[o]
        feat_ref[0, o, :, :] = jnp.maximum(acc, 0.0).astype(feat_ref.dtype)


# ---------------------------------------------------------------------------
# Deformation: identity grid + per-batch mean keypoint offset, lane-dense
# ---------------------------------------------------------------------------
def _deform_kernel(off_ref, grid_ref, def_ref):
    """off_ref: (bs*3,) SMEM; grid_ref: (1,3,tr,128) VMEM; def_ref: (1,3,tr,128) VMEM."""
    b = pl.program_id(0)
    for c in range(3):
        def_ref[0, c, :, :] = grid_ref[0, c, :, :] + off_ref[b * 3 + c]


def _compress_bn_relu(feature, params, eps, tr, n_rows):
    bs, c_in, d, h, w = feature.shape
    dhw = d * h * w
    n_tiles = n_rows // tr

    wc = params['compress_w'].astype(jnp.float32)      # (c_in, c_out)
    bc = params['compress_b'].astype(jnp.float32)      # (c_out,)
    gamma = params['bn_gamma'].astype(jnp.float32)
    beta = params['bn_beta'].astype(jnp.float32)
    c_out = wc.shape[1]

    # Free reshape: dhw is contiguous, no HBM relayout. Keep input dtype
    # (bf16 stays bf16 in HBM; cast to f32 per tile inside the kernels).
    x4 = feature.reshape(bs, c_in, n_rows, _LANES)

    smem = pl.BlockSpec(memory_space=pltpu.MemorySpace.SMEM)
    cparams = pltpu.CompilerParams(
        dimension_semantics=("parallel", "parallel"),
        vmem_limit_bytes=_VMEM_LIMIT)

    # ---- phase 1: per-tile partial BN stats (fully parallel grid) -----------
    psum = pl.pallas_call(
        functools.partial(_stats_kernel, c_in=c_in, c_out=c_out),
        out_shape=jax.ShapeDtypeStruct((bs, n_tiles, 2 * c_out, _LANES), jnp.float32),
        grid=(bs, n_tiles),
        in_specs=[pl.BlockSpec((1, c_in, tr, _LANES), lambda b, j: (b, 0, j, 0)),
                  smem, smem],
        out_specs=pl.BlockSpec((1, 1, 2 * c_out, _LANES), lambda b, j: (b, j, 0, 0)),
        compiler_params=cparams,
    )(x4, wc.reshape(-1), bc)

    # Tiny XLA reduce to finish the batch statistics.
    m = float(bs * dhw)
    mean = psum[:, :, :c_out, :].sum(axis=(0, 1, 3)) / m
    var = psum[:, :, c_out:, :].sum(axis=(0, 1, 3)) / m - mean * mean
    # TODO(synk): single-pass E[y^2]-mean^2 is slightly less stable than the
    # centered two-pass variance; kept in f32, validated against reference.
    inv_std = gamma * lax.rsqrt(var + eps)
    w_fold = (wc * inv_std[None, :]).reshape(-1)       # BN scale folded into weights
    b_fold = (bc - mean) * inv_std + beta              # conv bias + BN shift folded

    # ---- phase 2: recompute cheap conv, normalize + ReLU --------------------
    feat4 = pl.pallas_call(
        functools.partial(_norm_kernel, c_in=c_in, c_out=c_out),
        out_shape=jax.ShapeDtypeStruct((bs, c_out, n_rows, _LANES), feature.dtype),
        grid=(bs, n_tiles),
        in_specs=[pl.BlockSpec((1, c_in, tr, _LANES), lambda b, j: (b, 0, j, 0)),
                  smem, smem],
        out_specs=pl.BlockSpec((1, c_out, tr, _LANES), lambda b, j: (b, 0, j, 0)),
        compiler_params=cparams,
    )(x4, w_fold, b_fold)

    return feat4.reshape(bs, c_out, d, h, w)            # free reshape back to NCDHW


def dense_motion_init_forward(feature, kp_driving, kp_source, params, *,
                              eps=1e-5, estimate_occlusion_map=False,
                              compute_feature=True):
    """JAX/Pallas port of DenseMotionInit.forward.

    feature: (bs, feature_channel, d, h, w); kp_*: (bs, num_kp, 3) (== kp['value']).
    Returns (out_dict, compress->BN->ReLU feature or None).
    """
    bs, c_in, d, h, w = feature.shape
    num_kp = kp_driving.shape[1]
    dhw = d * h * w
    assert dhw % _LANES == 0, (
        "d*h*w must be a multiple of 128 for the lane-dense layout "
        "(TODO(synk): pad + mask the ragged tail).")
    n_rows = dhw // _LANES
    tr = _pick_row_tile(n_rows)
    n_tiles = n_rows // tr

    # ---- deformation = identity_grid + sum_k(kp_src - kp_drv) / (num_kp+1) --
    # Per-batch offsets: one tiny XLA reduce in the wrapper (not in-kernel SMEM loops).
    off = (kp_source.astype(jnp.float32)
           - kp_driving.astype(jnp.float32)).sum(axis=1) / float(num_kp + 1)   # (bs, 3)

    # Identity grid precomputed (data-independent, avoids in-kernel div/mod),
    # lane-dense layout: xyz on a leading axis, dhw as (rows, 128).
    gx = 2.0 * jnp.arange(w, dtype=jnp.float32) / (w - 1) - 1.0
    gy = 2.0 * jnp.arange(h, dtype=jnp.float32) / (h - 1) - 1.0
    gz = 2.0 * jnp.arange(d, dtype=jnp.float32) / (d - 1) - 1.0
    zz, yy, xx = jnp.meshgrid(gz, gy, gx, indexing='ij')               # each (d,h,w)
    id_grid = jnp.stack([xx, yy, zz], axis=0).reshape(1, 3, n_rows, _LANES)

    def_ld = pl.pallas_call(
        _deform_kernel,
        out_shape=jax.ShapeDtypeStruct((bs, 3, n_rows, _LANES), jnp.float32),
        grid=(bs, n_tiles),
        in_specs=[pl.BlockSpec(memory_space=pltpu.MemorySpace.SMEM),
                  pl.BlockSpec((1, 3, tr, _LANES), lambda b, j: (0, 0, j, 0))],
        out_specs=pl.BlockSpec((1, 3, tr, _LANES), lambda b, j: (b, 0, j, 0)),
        compiler_params=pltpu.CompilerParams(
            dimension_semantics=("parallel", "parallel"),
            vmem_limit_bytes=_VMEM_LIMIT),
    )(off.reshape(-1), id_grid)

    # (bs,3,dhw) -> PyTorch (bs,d,h,w,3). Small tensor; cheap relayout.
    deformation = def_ld.reshape(bs, 3, dhw).transpose(0, 2, 1).reshape(bs, d, h, w, 3)

    out_dict = {'deformation': deformation}

    feat = None
    if compute_feature or estimate_occlusion_map:
        # In the default config (estimate_occlusion_map=False) PyTorch discards
        # this result; set compute_feature=False to skip all of its HBM traffic.
        feat = _compress_bn_relu(feature, params, eps, tr, n_rows)

    if estimate_occlusion_map:
        # The PyTorch forward overwrites sigmoid(conv7x7) with torch.ones(...).
        # TODO(synk): the 7x7 occlusion Conv2d output is dead code in the module.
        out_dict['occlusion_map'] = jnp.ones((bs, 1, h, w), jnp.float32)

    return out_dict, feat


# ---------------------------------------------------------------------------
# Pure-JAX reference for verification
# ---------------------------------------------------------------------------
def _reference(feature_ncdhw, kp_d, kp_s, params, eps=1e-5):
    bs, c_in, d, h, w = feature_ncdhw.shape
    k = kp_d.shape[1]
    x = jnp.transpose(feature_ncdhw, (0, 2, 3, 4, 1)).reshape(-1, c_in)
    y = x @ params['compress_w'] + params['compress_b']
    mean = y.mean(0)
    var = ((y - mean) ** 2).mean(0)                     # biased batch stats (BN train)
    yn = (y - mean) / jnp.sqrt(var + eps) * params['bn_gamma'] + params['bn_beta']
    feat = jnp.maximum(yn, 0.0).reshape(bs, d, h, w, -1).transpose(0, 4, 1, 2, 3)

    xs = 2.0 * jnp.arange(w, dtype=jnp.float32) / (w - 1) - 1.0
    ys = 2.0 * jnp.arange(h, dtype=jnp.float32) / (h - 1) - 1.0
    zs = 2.0 * jnp.arange(d, dtype=jnp.float32) / (d - 1) - 1.0
    zz, yy, xx = jnp.meshgrid(zs, ys, xs, indexing='ij')
    grid = jnp.stack([xx, yy, zz], axis=-1)             # (d, h, w, 3)
    offset = (kp_s - kp_d).sum(axis=1) / (k + 1.0)      # (bs, 3)
    deformation = grid[None] + offset[:, None, None, None, :]
    return deformation, feat


if __name__ == "__main__":
    key = jax.random.PRNGKey(0)
    bs, c_in, d, h, w = 2, 4, 4, 16, 16      # feature_channel=4, reshape_depth=4
    compress, num_kp = 4, 8

    k1, k2, k3, k4, k5 = jax.random.split(key, 5)
    feature = jax.random.normal(k1, (bs, c_in, d, h, w), jnp.float32)
    kp_driving = jax.random.uniform(k2, (bs, num_kp, 3), jnp.float32, -1.0, 1.0)
    kp_source = jax.random.uniform(k3, (bs, num_kp, 3), jnp.float32, -1.0, 1.0)

    params = {
        'compress_w': 0.1 * jax.random.normal(k4, (c_in, compress), jnp.float32),
        'compress_b': 0.1 * jax.random.normal(k5, (compress,), jnp.float32),
        'bn_gamma': jnp.ones((compress,), jnp.float32),
        'bn_beta': jnp.zeros((compress,), jnp.float32),
    }

    out_dict, feat = dense_motion_init_forward(feature, kp_driving, kp_source, params)
    jax.block_until_ready(out_dict['deformation'])
    jax.block_until_ready(feat)

    ref_def, ref_feat = _reference(feature, kp_driving, kp_source, params)
    np.testing.assert_allclose(np.asarray(out_dict['deformation']),
                               np.asarray(ref_def), rtol=1e-5, atol=1e-5)
    np.testing.assert_allclose(np.asarray(feat), np.asarray(ref_feat),
                               rtol=1e-4, atol=1e-4)
    print("KERNEL_OK")
</pallas_src>

<mosaic_0001>
module attributes {stable_mosaic.version = 11 : i64} {
  func.func @_deform_kernel(%arg0: i32, %arg1: i32, %arg2: memref<6xf32, #tpu.memory_space<smem>>, %arg3: memref<1x3x8x128xf32, #tpu.memory_space<vmem>>, %arg4: memref<1x3x8x128xf32, #tpu.memory_space<vmem>>) attributes {dimension_semantics = [#tpu.dimension_semantics<parallel>, #tpu.dimension_semantics<parallel>], iteration_bounds = array<i64: 2, 1>, scalar_prefetch = 0 : i64, scratch_operands = 0 : i64, tpu.core_type = #tpu.core_type<tc>, window_params = [{transform_indices = @transform_0, window_bounds = array<i64: 6>}, {transform_indices = @transform_1, window_bounds = array<i64: 1, 3, 8, 128>}, {transform_indices = @transform_2, window_bounds = array<i64: 1, 3, 8, 128>}]} {
    %c0 = arith.constant 0 : index
    %c0_0 = arith.constant 0 : index
    %c0_1 = arith.constant 0 : index
    %c0_2 = arith.constant 0 : index
    %0 = vector.load %arg3[%c0, %c0_0, %c0_1, %c0_2] : memref<1x3x8x128xf32, #tpu.memory_space<vmem>>, vector<1x1x8x128xf32>
    %1 = vector.shape_cast %0 : vector<1x1x8x128xf32> to vector<8x128xf32>
    %c3_i32 = arith.constant 3 : i32
    %2 = arith.muli %arg0, %c3_i32 : i32
    %c0_i32 = arith.constant 0 : i32
    %3 = arith.addi %2, %c0_i32 : i32
    %4 = arith.index_cast %3 : i32 to index
    %5 = memref.load %arg2[%4] : memref<6xf32, #tpu.memory_space<smem>>
    %6 = vector.broadcast %5 : f32 to vector<8x128xf32>
    %7 = arith.addf %1, %6 : vector<8x128xf32>
    %c0_3 = arith.constant 0 : index
    %c0_4 = arith.constant 0 : index
    %c0_5 = arith.constant 0 : index
    %c0_6 = arith.constant 0 : index
    %8 = vector.load %arg4[%c0_3, %c0_4, %c0_5, %c0_6] : memref<1x3x8x128xf32, #tpu.memory_space<vmem>>, vector<1x1x8x128xf32>
    %9 = vector.shape_cast %8 : vector<1x1x8x128xf32> to vector<8x128xf32>
    %10 = vector.shape_cast %7 : vector<8x128xf32> to vector<1x1x8x128xf32>
    tpu.vector_store %arg4[%c0_3, %c0_4, %c0_5, %c0_6], %10 {strides = array<i32>} : memref<1x3x8x128xf32, #tpu.memory_space<vmem>>, vector<1x1x8x128xf32>,
    %c0_7 = arith.constant 0 : index
    %c1 = arith.constant 1 : index
    %c0_8 = arith.constant 0 : index
    %c0_9 = arith.constant 0 : index
    %11 = vector.load %arg3[%c0_7, %c1, %c0_8, %c0_9] : memref<1x3x8x128xf32, #tpu.memory_space<vmem>>, vector<1x1x8x128xf32>
    %12 = vector.shape_cast %11 : vector<1x1x8x128xf32> to vector<8x128xf32>
    %c3_i32_10 = arith.constant 3 : i32
    %13 = arith.muli %arg0, %c3_i32_10 : i32
    %c1_i32 = arith.constant 1 : i32
    %14 = arith.addi %13, %c1_i32 : i32
    %15 = arith.index_cast %14 : i32 to index
    %16 = memref.load %arg2[%15] : memref<6xf32, #tpu.memory_space<smem>>
    %17 = vector.broadcast %16 : f32 to vector<8x128xf32>
    %18 = arith.addf %12, %17 : vector<8x128xf32>
    %c0_11 = arith.constant 0 : index
    %c1_12 = arith.constant 1 : index
    %c0_13 = arith.constant 0 : index
    %c0_14 = arith.constant 0 : index
    %19 = vector.load %arg4[%c0_11, %c1_12, %c0_13, %c0_14] : memref<1x3x8x128xf32, #tpu.memory_space<vmem>>, vector<1x1x8x128xf32>
    %20 = vector.shape_cast %19 : vector<1x1x8x128xf32> to vector<8x128xf32>
    %21 = vector.shape_cast %18 : vector<8x128xf32> to vector<1x1x8x128xf32>
    tpu.vector_store %arg4[%c0_11, %c1_12, %c0_13, %c0_14], %21 {strides = array<i32>} : memref<1x3x8x128xf32, #tpu.memory_space<vmem>>, vector<1x1x8x128xf32>,
    %c0_15 = arith.constant 0 : index
    %c2 = arith.constant 2 : index
    %c0_16 = arith.constant 0 : index
    %c0_17 = arith.constant 0 : index
    %22 = vector.load %arg3[%c0_15, %c2, %c0_16, %c0_17] : memref<1x3x8x128xf32, #tpu.memory_space<vmem>>, vector<1x1x8x128xf32>
    %23 = vector.shape_cast %22 : vector<1x1x8x128xf32> to vector<8x128xf32>
    %c3_i32_18 = arith.constant 3 : i32
    %24 = arith.muli %arg0, %c3_i32_18 : i32
    %c2_i32 = arith.constant 2 : i32
    %25 = arith.addi %24, %c2_i32 : i32
    %26 = arith.index_cast %25 : i32 to index
    %27 = memref.load %arg2[%26] : memref<6xf32, #tpu.memory_space<smem>>
    %28 = vector.broadcast %27 : f32 to vector<8x128xf32>
    %29 = arith.addf %23, %28 : vector<8x128xf32>
    %c0_19 = arith.constant 0 : index
    %c2_20 = arith.constant 2 : index
    %c0_21 = arith.constant 0 : index
    %c0_22 = arith.constant 0 : index
    %30 = vector.load %arg4[%c0_19, %c2_20, %c0_21, %c0_22] : memref<1x3x8x128xf32, #tpu.memory_space<vmem>>, vector<1x1x8x128xf32>
    %31 = vector.shape_cast %30 : vector<1x1x8x128xf32> to vector<8x128xf32>
    %32 = vector.shape_cast %29 : vector<8x128xf32> to vector<1x1x8x128xf32>
    tpu.vector_store %arg4[%c0_19, %c2_20, %c0_21, %c0_22], %32 {strides = array<i32>} : memref<1x3x8x128xf32, #tpu.memory_space<vmem>>, vector<1x1x8x128xf32>,
    return
  }
  func.func @transform_0(%arg0: i32, %arg1: i32) -> i32 {
    %c0_i32 = arith.constant 0 : i32
    %c0_i32_0 = arith.constant 0 : i32
    return %c0_i32 : i32
  }
  func.func @transform_1(%arg0: i32, %arg1: i32) -> (i32, i32, i32, i32) {
    %c0_i32 = arith.constant 0 : i32
    %c0_i32_0 = arith.constant 0 : i32
    %c0_i32_1 = arith.constant 0 : i32
    %c0_i32_2 = arith.constant 0 : i32
    return %c0_i32, %c0_i32_0, %arg1, %c0_i32_1 : i32, i32, i32, i32
  }
  func.func @transform_2(%arg0: i32, %arg1: i32) -> (i32, i32, i32, i32) {
    %c0_i32 = arith.constant 0 : i32
    %c0_i32_0 = arith.constant 0 : i32
    %c0_i32_1 = arith.constant 0 : i32
    return %arg0, %c0_i32, %arg1, %c0_i32_0 : i32, i32, i32, i32
  }
}

</mosaic_0001>

<bundles_post_ra>
// kernel: tpu_custom_call.1
= control target key start
LH: loop header
LB: loop body
LE: loop exit
PB: predicated region body
PF: predicated region fallthrough
CT: control target
= control target key end

     0   :  { %7 = vsyncpa [#allocation5], 0  ;;  %s722_s0 = inlined_call_operand.hbm [shape: f32[6], index: 0, kind: input, shape index: {}]   ;;  %s723_s1 = inlined_call_operand.hbm [shape: f32[1,3,8,128], index: 1, kind: input, shape index: {}]   ;;  %s724_s2 = inlined_call_operand.hbm [shape: f32[2,3,8,128], index: 2, kind: output, shape index: {}]  }
   0x1   :  { %8 = vsyncpa [#allocation3], 0 }
   0x2   :  { %9 = vsyncpa [#allocation4], 0 }
   0x3   :  { %11 = vsyncpa [#allocation4 + $0x1], 0  ;;  %s539_s9 = smov 0   ;;  %s541_s10 = smov 0  }
   0x4   :  { %s543_s11 = smov 0   ;;  %s545_s12 = smov 0  }
   0x5   :  { %s547_s13 = smov 0   ;;  %s549_s14 = smov 0  }
   0x6 LB: > { %s293_s15 = sadd.s32 4294967295, %s515_s14   ;;  %s294_s16 = sadd.s32 4294967294, %s515_s14   ;;  %s515_s14 = sphi %s549_s14, %s17_s14   ;;  %s511_s13 = sphi %s547_s13, %s737_s13   ;;  %s507_s12 = sphi %s545_s12, %s736_s12   ;;  %s503_s11 = sphi %s543_s11, %s735_s11   ;;  %s499_s10 = sphi %s541_s10, %s734_s10   ;;  %s495_s9 = sphi %s539_s9, %s733_s9  }
   0x7   : > { %s29_s17 = sadd.s32 1, %s511_s13  ;;  %s85_s18 = sadd.s32 1, %s503_s11 }
   0x8   : > { %p31_p0 = scmp.ge.s32.totalorder %s29_s17, 2  ;;  %p95_p1 = scmp.ne.s32.totalorder %s503_s11, %s499_s10 }
   0x9   : > { %p96_p2 = scmp.eq.s32.totalorder %s293_s15, 1  ;;  %p101_p3 = scmp.ne.s32.totalorder %s499_s10, %s495_s9 }
   0xa   : > { %s739_s17 = smov (%p31_p0, %s29_s17), 0  ;;  %p102_p5 = scmp.eq.s32.totalorder %s294_s16, 1 }
   0xb   : > { %p579_p4 = por %p96_p2, %p95_p1  ;;  %s80_s20 = ssub.s32 %s511_s13, %s739_s17 }
   0xc   : > { %p295_p6 = scmp.ge.s32.totalorder %s515_s14, 1  ;;  %p83_p7 = scmp.eq.s32.totalorder %s80_s20, 0 }
   0xd   : > { %s726_s19 = scalar_select %p579_p4, 1, 0 }
   0xe   : > { %p586_p8 = por %p102_p5, %p101_p3  ;;  %p109_p9 = scmp.lt.s32.totalorder %s515_s14, 3 }
   0xf   : > { %s592_s22 = scalar_select %p83_p7, %s503_s11, %s85_s18  }
  0x10   : > { %s727_s21 = scalar_select %p586_p8, 1, 0 }
  0x11   : > { %p594_p10 = pnand %p295_p6, %p109_p9  ;;  %p598_p11 = scmp.eq.s32.totalorder %s293_s15, 0 }
  0x12   : > { %s517_s25 = smov [#allocation6]   ;;  %s388_s30 = scalar_lea.hbm %s722_s0, 16 }
  0x13   : > { %p318_p12 = pneg %p594_p10  ;;  %s132_s26 = sshll.u32 %s517_s25, 4  ;;  %s610_s26 = int_to_ptr.vmem [resolvable:$true] %s132_s26 }
  0x14   : > { %p389_p0 = scmp.ne.s32.totalorder %s722_s0, %s388_s30  ;;  %p395_p5 = scmp.lt.u32.totalorder %s388_s30, %s722_s0 }
  0x15   : > { %p606_p13 = pnand %p598_p11, %p318_p12 }
  0x17   : > { %p390_p1 = pneg %p606_p13 }
  0x19   : > { %p391_p2 = pnand %p390_p1, %p389_p0 }
  0x1b   : > { %p392_p3 = pneg %p391_p2 }
  0x1d   : > { %p397_p6 = pnand %p395_p5, %p392_p3 }
  0x1f   : > { %400 = shalt.err (!%p397_p6)
}
  0x20   : > { %s518_s7 = smov [#allocation2]   ;;  %s401_s20 = scalar_lea.hbm %s723_s1, 384 }
  0x21   : > { %321 = dma.hbm_to_smem (!%p606_p13), %s722_s0, 16, %s518_s7, [#allocation5]  }
  0x22   : > { %p402_p7 = scmp.ne.s32.totalorder %s723_s1, %s401_s20  ;;  %p408_p0 = scmp.lt.u32.totalorder %s401_s20, %s723_s1 }
  0x24   : > { %p404_p9 = pnand %p402_p7, %p390_p1 }
  0x26   : > { %p405_p12 = pneg %p404_p9 }
  0x28   : > { %p410_p2 = pnand %p408_p0, %p405_p12 }
  0x2a   : > { %413 = shalt.err (!%p410_p2)
}
  0x2b   : > { %s414_s3 = scalar_lea.vmem %s610_s26, 384  ;;  %p422_p8 = scmp.lt.s32.totalorder %s610_s26, %s610_s26 }
  0x2c   : > { %p415_p3 = scmp.ne.s32.totalorder %s610_s26, %s414_s3  ;;  %p423_p7 = scmp.lt.s32.totalorder %s414_s3, %s414_s3 }
  0x2e   : > { %p417_p5 = pnand %p415_p3, %p390_p1  ;;  %p424_p9 = por %p423_p7, %p422_p8 }
  0x30   : > { %p418_p6 = pneg %p417_p5 }
  0x32   : > { %p425_p4 = pnand %p424_p9, %p418_p6 }
  0x34   : > { %428 = shalt.err (!%p425_p4)
}
  0x35   : > { %s519_s4 = smov 128   ;;  %s520_s5 = smov 8  }
  0x36   : > { %324 = dma.hbm_to_vmem [thread:$0]  (!%p606_p13), %s723_s1, 384, %s610_s26, [#allocation3], %s519_s4, %s519_s4, %s520_s5  }
  0x37   : > { %148 = sbr.rel (%p594_p10) target bundleno = 98 (0x62), region = 28 }
  0x3e   : > { %482 = dma.done.wait (%p598_p11), [#allocation5], 16  }
  0x3f   : > { %484 = vsyncadd (%p598_p11), [#allocation5], 4294967280 }
  0x40   : > { %486 = dma.done.wait (%p598_p11), [#allocation3], 384  }
  0x41   : > { %488 = vsyncadd (%p598_p11), [#allocation3], 4294966912 }
  0x42   : > { %158 = sfence }
  0x43   : > { %s167_s26 = sand.u32 1, %s499_s10   ;;  %s171_s27 = smul.u32 3, %s507_s12  ;;  %v170_v0 = vld [vmem:[#allocation6] sm:$0xff]  ;;  %v177_v1 = vld [vmem:[#allocation6 + $0x8] sm:$0xff]  ;;  %v185_v5 = vld [vmem:[#allocation6 + $0x10] sm:$0xff] }
  0x44   : > { %s306_s23 = smul.u32 24, %s167_s26  ;;  %p731_p8 = scmp.ne.s32.totalorder %s726_s19, 0 }
  0x45   : > { %s172_s8 = sld [smem:[#allocation2 + %s171_s27]]  ;;  %s178_s15 = sadd.s32 1, %s171_s27 }
  0x46   : > { %s179_s16 = sld [smem:[#allocation2 + %s178_s15]]  ;;  %s186_s18 = sadd.s32 2, %s171_s27 }
  0x47   : > { %s187_s20 = sld [smem:[#allocation2 + %s186_s18]]  ;;  %s169_s25 = scalar_lea.vmem [#allocation7], %s306_s23 }
  0x48   : > { %s207_s28 = sshll.u32 %s169_s25, 4  ;;  %s307_s24 = smul.u32 384, %s507_s12  ;;  %s669_s28 = int_to_ptr.vmem [resolvable:$true] %s207_s28 }
  0x49   : > { %s676_s12 = scalar_lea.sflag [#allocation4], %s167_s26  ;;  %s429_s4 = scalar_lea.vmem %s669_s28, 384 }
  0x4a   : > { %s674_s3 = scalar_lea.hbm %s724_s2, %s307_s24  ;;  %p430_p4 = scmp.ne.s32.totalorder %s669_s28, %s429_s4 }
  0x4b   : > { %v173_v2 = vstv %s172_s8  ;;  %s521_s5 = smov [#allocation7]  }
  0x4c   : > { %v174_v3 = vadd.f32 %v173_v2, %v170_v0  ;;  %v180_v4 = vstv %s179_s16  ;;  %p431_p10 = pnand %p430_p4, %p731_p8  ;;  %s433_s6 = sshll.u32 %s521_s5, 4  ;;  %s434_s6 = int_to_ptr.vmem [resolvable:$false] %s433_s6 }
  0x4d   : > { %v181_v6 = vadd.f32 %v180_v4, %v177_v1  ;;  %v188_v7 = vstv %s187_s20  ;;  %s435_s7 = scalar_lea.vmem %s434_s6, 768  ;;  %p436_p13 = scmp.lt.s32.totalorder %s669_s28, %s434_s6 }
  0x4e   : > { %175 = vst [vmem:[%s169_s25] sm:$0xff] %v174_v3  ;;  %v189_v8 = vadd.f32 %v188_v7, %v185_v5  ;;  %p432_p11 = pneg %p431_p10  ;;  %p437_p1 = scmp.lt.s32.totalorder %s435_s7, %s429_s4 }
  0x4f   : > { %301 = vst [vmem:[%s169_s25 + $0x8] sm:$0xff] %v181_v6 }
  0x50   : > { %302 = vst [vmem:[%s169_s25 + $0x10] sm:$0xff] %v189_v8  ;;  %p438_p12 = por %p437_p1, %p436_p13 }
  0x52   : > { %p439_p0 = pnand %p438_p12, %p432_p11 }
  0x54   : > { %442 = shalt.err (!%p439_p0)
}
  0x55   : > { %s443_s26 = scalar_lea.hbm %s674_s3, 384  ;;  %s447_s8 = scalar_lea.hbm %s724_s2, 768 }
  0x56   : > { %p444_p2 = scmp.ne.s32.totalorder %s674_s3, %s443_s26  ;;  %p448_p6 = scmp.lt.u32.totalorder %s674_s3, %s724_s2 }
  0x57   : > { %p449_p7 = scmp.lt.u32.totalorder %s447_s8, %s443_s26  ;;  %p451_p4 = scmp.lt.u32.totalorder %s443_s26, %s674_s3 }
  0x58   : > { %p445_p3 = pnand %p444_p2, %p731_p8 }
  0x59   : > { %p450_p9 = por %p449_p7, %p448_p6 }
  0x5a   : > { %p446_p5 = pneg %p445_p3 }
  0x5b   : > { %p452_p10 = por %p451_p4, %p450_p9 }
  0x5d   : > { %p453_p11 = pnand %p452_p10, %p446_p5 }
  0x5f   : > { %456 = shalt.err (!%p453_p11)
}
  0x60   : > { %s522_s18 = smov 128   ;;  %s523_s20 = smov 8  }
  0x61   : > { %316 = dma.vmem_to_hbm [thread:$0]  (%p731_p8), %s669_s28, 384, %s674_s3, %s676_s12, %s522_s18, %s522_s18, %s523_s20  }
  0x62 PF: > { %p333_p13 = scmp.ge.s32.totalorder %s515_s14, 2  ;;  %s222_s25 = sand.u32 1, %s495_s9  }
  0x63   : > { %p732_p1 = scmp.ne.s32.totalorder %s727_s21, 0  ;;  %s223_s24 = scalar_lea.sflag [#allocation4], %s222_s25 }
  0x65   : > { %p326_p12 = pnand %p333_p13, %p732_p1 }
  0x67   : > { %490 = dma.done.wait (!%p326_p12), %s223_s24, 384  }
  0x68   : > { %492 = vsyncadd (!%p326_p12), %s223_s24, 4294966912  ;;  %s17_s14 = sadd.s32 1, %s515_s14   ;;  %s733_s9 = smov %s499_s10 }
  0x69   : > { %p14_p0 = scmp.ge.s32.totalorder %s17_s14, 4   ;;  %s734_s10 = smov %s503_s11 }
  0x6a   : > { %s735_s11 = smov %s592_s22  ;;  %s736_s12 = smov %s511_s13 }
  0x6b   : > { %s737_s13 = smov %s739_s17  ;;  %16 = sbr.rel (!%p14_p0) target bundleno = 6 (0x6), region = 75 }
  0x72   :  { %228 = vsyncpa [#allocation3], 1 }
  0x73   :  { %230 = vsyncpa [#allocation3 + $0x1], 1 }
  0x74   :  { %231 = vsyncpa [#allocation4], 1 }
  0x75   :  { %233 = vsyncpa [#allocation4 + $0x1], 1 }
  0x76   :  { %234 = vsyncpa [#allocation5], 1 }
  0x77   :  { %236 = vsyncpa [#allocation5 + $0x1], 1 }

</bundles_post_ra>
